<compile_context>
chip_gen: v5e
topology: v5e:2x2
jax: 0.10.0
libtpu: 0.0.40
codegen_flags: <defaults>
</compile_context>

<pallas_src>
import jax
import jax.numpy as jnp
from jax.experimental import pallas as pl
from jax.experimental.pallas import tpu as pltpu


def _round_up(a: int, b: int) -> int:
    return ((a + b - 1) // b) * b


def _transpose_matmul_kernel(p_ref, xT_ref, oT_ref):
    # p_ref:  SMEM [N, K]   (20 scalars)
    # xT_ref: VMEM [K, bm]  (lane-dense on M)
    # oT_ref: VMEM [N, bm]  (lane-dense on M)
    N, K = p_ref.shape
    x = xT_ref[...].astype(jnp.float32)                  # [K, bm]
    for n in range(N):                                   # N=5: fully unrolled
        coef = p_ref[n, 0].astype(jnp.float32) * 4.0     # scalar op (free);
        acc = coef * x[0:1, :]                           # folds both *2.0
        for k in range(1, K):                            # K=4: unrolled FMAs
            coef = p_ref[n, k].astype(jnp.float32) * 4.0
            acc = acc + coef * x[k : k + 1, :]
        oT_ref[n : n + 1, :] = acc.astype(oT_ref.dtype)  # lane-dense store


def transpose_matmul(x: jax.Array, param: jax.Array, *, block_m: int = 65536) -> jax.Array:
    """Pallas equivalent of TransposeMatmulModel(fuse_linear=True).forward."""
    M, K = x.shape
    N, K2 = param.shape
    assert K == K2, f"inner dims must match, got {K} vs {K2}"
    assert block_m % 128 == 0, "block_m must be a multiple of the 128-lane width"

    out_dtype = jnp.promote_types(x.dtype, param.dtype)

    # Present x lane-dense: M on the 128-lane axis.
    xT = x.T  # [K, M]

    # --- M tiling ------------------------------------------------------------
    # Tiny M: single full-extent block (full-extent dims are always legal).
    # Large M: 128-multiple tiles, big enough to amortize per-step overhead but
    # always >= 2 grid steps so both v7x TensorCores get work. Ragged last
    # block is handled by Pallas' masked edge block (columns are independent).
    MIN_SPLIT_M = 4096
    if M <= MIN_SPLIT_M:
        bm = M
    else:
        bm = min(block_m, _round_up(-(-M // 2), 128))
    grid_m = pl.cdiv(M, bm)

    # --- compiler params -----------------------------------------------------
    in_bytes = K * bm * jnp.dtype(x.dtype).itemsize
    out_bytes = N * bm * jnp.dtype(out_dtype).itemsize
    block_bytes = in_bytes + out_bytes
    compiler_kwargs = {"dimension_semantics": ("parallel",)}  # M tiles independent
    # Raise the scoped-VMEM limit only when double-buffered blocks would be
    # tight under the smallest default (v5e ~16 MiB); cap well under v7x's
    # 64 MiB physical VMEM.
    if 2 * block_bytes > 12 * 1024 * 1024:
        compiler_kwargs["vmem_limit_bytes"] = int(
            min(4 * block_bytes + (2 << 20), 48 * 1024 * 1024)
        )

    outT = pl.pallas_call(
        _transpose_matmul_kernel,
        out_shape=jax.ShapeDtypeStruct((N, M), out_dtype),
        grid=(grid_m,),
        in_specs=[
            # param: 20 scalars, resident in SMEM for scalar-indexed reads.
            pl.BlockSpec(memory_space=pltpu.MemorySpace.SMEM),
            # xT: [K, bm] tiles, lane-dense on M.
            pl.BlockSpec((K, bm), lambda i: (0, i)),
        ],
        out_specs=pl.BlockSpec((N, bm), lambda i: (0, i)),
        compiler_params=pltpu.CompilerParams(**compiler_kwargs),
    )(param, xT)

    # Back to the module's [M, N] layout.
    return outT.T


if __name__ == "__main__":
    key = jax.random.PRNGKey(0)
    kx, kp = jax.random.split(key)

    # Small shapes consistent with the module: param is (5, 4) => K = 4.
    x = jax.random.uniform(kx, (8, 4), dtype=jnp.float32)
    param = jax.random.uniform(kp, (5, 4), dtype=jnp.float32)

    out = transpose_matmul(x, param)
    out = jax.block_until_ready(out)

    # Reference: plain-JAX version of the PyTorch forward.
    ref = (x * 2.0) @ (param * 2.0).T
    assert out.shape == (8, 5), out.shape
    assert jnp.allclose(out, ref, rtol=1e-5, atol=1e-5), "mismatch vs reference"

    print("KERNEL_OK")
</pallas_src>

<mosaic_0001>
module attributes {stable_mosaic.version = 11 : i64} {
  func.func @_transpose_matmul_kernel(%arg0: i32, %arg1: memref<5x4xf32, #tpu.memory_space<smem>>, %arg2: memref<4x8xf32, #tpu.memory_space<vmem>>, %arg3: memref<5x8xf32, #tpu.memory_space<vmem>>) attributes {dimension_semantics = [#tpu.dimension_semantics<parallel>], iteration_bounds = array<i64: 1>, scalar_prefetch = 0 : i64, scratch_operands = 0 : i64, tpu.core_type = #tpu.core_type<tc>, window_params = [{transform_indices = @transform_0, window_bounds = array<i64: 5, 4>}, {transform_indices = @transform_1, window_bounds = array<i64: 4, 8>}, {transform_indices = @transform_2, window_bounds = array<i64: 5, 8>}]} {
    %c0 = arith.constant 0 : index
    %c0_0 = arith.constant 0 : index
    %0 = vector.load %arg2[%c0, %c0_0] : memref<4x8xf32, #tpu.memory_space<vmem>>, vector<4x8xf32>
    %c0_1 = arith.constant 0 : index
    %c0_2 = arith.constant 0 : index
    %1 = memref.load %arg1[%c0_1, %c0_2] : memref<5x4xf32, #tpu.memory_space<smem>>
    %cst = arith.constant 4.000000e+00 : f32
    %2 = arith.mulf %1, %cst : f32
    %3 = vector.extract_strided_slice %0 {offsets = [0, 0], sizes = [1, 8], strides = [1, 1]} : vector<4x8xf32> to vector<1x8xf32>
    %4 = vector.broadcast %2 : f32 to vector<1x8xf32>
    %5 = arith.mulf %4, %3 : vector<1x8xf32>
    %c0_3 = arith.constant 0 : index
    %c1 = arith.constant 1 : index
    %6 = memref.load %arg1[%c0_3, %c1] : memref<5x4xf32, #tpu.memory_space<smem>>
    %cst_4 = arith.constant 4.000000e+00 : f32
    %7 = arith.mulf %6, %cst_4 : f32
    %8 = vector.extract_strided_slice %0 {offsets = [1, 0], sizes = [1, 8], strides = [1, 1]} : vector<4x8xf32> to vector<1x8xf32>
    %9 = vector.broadcast %7 : f32 to vector<1x8xf32>
    %10 = arith.mulf %9, %8 : vector<1x8xf32>
    %11 = arith.addf %5, %10 : vector<1x8xf32>
    %c0_5 = arith.constant 0 : index
    %c2 = arith.constant 2 : index
    %12 = memref.load %arg1[%c0_5, %c2] : memref<5x4xf32, #tpu.memory_space<smem>>
    %cst_6 = arith.constant 4.000000e+00 : f32
    %13 = arith.mulf %12, %cst_6 : f32
    %14 = vector.extract_strided_slice %0 {offsets = [2, 0], sizes = [1, 8], strides = [1, 1]} : vector<4x8xf32> to vector<1x8xf32>
    %15 = vector.broadcast %13 : f32 to vector<1x8xf32>
    %16 = arith.mulf %15, %14 : vector<1x8xf32>
    %17 = arith.addf %11, %16 : vector<1x8xf32>
    %c0_7 = arith.constant 0 : index
    %c3 = arith.constant 3 : index
    %18 = memref.load %arg1[%c0_7, %c3] : memref<5x4xf32, #tpu.memory_space<smem>>
    %cst_8 = arith.constant 4.000000e+00 : f32
    %19 = arith.mulf %18, %cst_8 : f32
    %20 = vector.extract_strided_slice %0 {offsets = [3, 0], sizes = [1, 8], strides = [1, 1]} : vector<4x8xf32> to vector<1x8xf32>
    %21 = vector.broadcast %19 : f32 to vector<1x8xf32>
    %22 = arith.mulf %21, %20 : vector<1x8xf32>
    %23 = arith.addf %17, %22 : vector<1x8xf32>
    %c0_9 = arith.constant 0 : index
    %c0_10 = arith.constant 0 : index
    %24 = vector.load %arg3[%c0_9, %c0_10] : memref<5x8xf32, #tpu.memory_space<vmem>>, vector<1x8xf32>
    tpu.vector_store %arg3[%c0_9, %c0_10], %23 {strides = array<i32>} : memref<5x8xf32, #tpu.memory_space<vmem>>, vector<1x8xf32>,
    %c1_11 = arith.constant 1 : index
    %c0_12 = arith.constant 0 : index
    %25 = memref.load %arg1[%c1_11, %c0_12] : memref<5x4xf32, #tpu.memory_space<smem>>
    %cst_13 = arith.constant 4.000000e+00 : f32
    %26 = arith.mulf %25, %cst_13 : f32
    %27 = vector.extract_strided_slice %0 {offsets = [0, 0], sizes = [1, 8], strides = [1, 1]} : vector<4x8xf32> to vector<1x8xf32>
    %28 = vector.broadcast %26 : f32 to vector<1x8xf32>
    %29 = arith.mulf %28, %27 : vector<1x8xf32>
    %c1_14 = arith.constant 1 : index
    %c1_15 = arith.constant 1 : index
    %30 = memref.load %arg1[%c1_14, %c1_15] : memref<5x4xf32, #tpu.memory_space<smem>>
    %cst_16 = arith.constant 4.000000e+00 : f32
    %31 = arith.mulf %30, %cst_16 : f32
    %32 = vector.extract_strided_slice %0 {offsets = [1, 0], sizes = [1, 8], strides = [1, 1]} : vector<4x8xf32> to vector<1x8xf32>
    %33 = vector.broadcast %31 : f32 to vector<1x8xf32>
    %34 = arith.mulf %33, %32 : vector<1x8xf32>
    %35 = arith.addf %29, %34 : vector<1x8xf32>
    %c1_17 = arith.constant 1 : index
    %c2_18 = arith.constant 2 : index
    %36 = memref.load %arg1[%c1_17, %c2_18] : memref<5x4xf32, #tpu.memory_space<smem>>
    %cst_19 = arith.constant 4.000000e+00 : f32
    %37 = arith.mulf %36, %cst_19 : f32
    %38 = vector.extract_strided_slice %0 {offsets = [2, 0], sizes = [1, 8], strides = [1, 1]} : vector<4x8xf32> to vector<1x8xf32>
    %39 = vector.broadcast %37 : f32 to vector<1x8xf32>
    %40 = arith.mulf %39, %38 : vector<1x8xf32>
    %41 = arith.addf %35, %40 : vector<1x8xf32>
    %c1_20 = arith.constant 1 : index
    %c3_21 = arith.constant 3 : index
    %42 = memref.load %arg1[%c1_20, %c3_21] : memref<5x4xf32, #tpu.memory_space<smem>>
    %cst_22 = arith.constant 4.000000e+00 : f32
    %43 = arith.mulf %42, %cst_22 : f32
    %44 = vector.extract_strided_slice %0 {offsets = [3, 0], sizes = [1, 8], strides = [1, 1]} : vector<4x8xf32> to vector<1x8xf32>
    %45 = vector.broadcast %43 : f32 to vector<1x8xf32>
    %46 = arith.mulf %45, %44 : vector<1x8xf32>
    %47 = arith.addf %41, %46 : vector<1x8xf32>
    %c1_23 = arith.constant 1 : index
    %c0_24 = arith.constant 0 : index
    %48 = vector.load %arg3[%c1_23, %c0_24] : memref<5x8xf32, #tpu.memory_space<vmem>>, vector<1x8xf32>
    tpu.vector_store %arg3[%c1_23, %c0_24], %47 {strides = array<i32>} : memref<5x8xf32, #tpu.memory_space<vmem>>, vector<1x8xf32>,
    %c2_25 = arith.constant 2 : index
    %c0_26 = arith.constant 0 : index
    %49 = memref.load %arg1[%c2_25, %c0_26] : memref<5x4xf32, #tpu.memory_space<smem>>
    %cst_27 = arith.constant 4.000000e+00 : f32
    %50 = arith.mulf %49, %cst_27 : f32
    %51 = vector.extract_strided_slice %0 {offsets = [0, 0], sizes = [1, 8], strides = [1, 1]} : vector<4x8xf32> to vector<1x8xf32>
    %52 = vector.broadcast %50 : f32 to vector<1x8xf32>
    %53 = arith.mulf %52, %51 : vector<1x8xf32>
    %c2_28 = arith.constant 2 : index
    %c1_29 = arith.constant 1 : index
    %54 = memref.load %arg1[%c2_28, %c1_29] : memref<5x4xf32, #tpu.memory_space<smem>>
    %cst_30 = arith.constant 4.000000e+00 : f32
    %55 = arith.mulf %54, %cst_30 : f32
    %56 = vector.extract_strided_slice %0 {offsets = [1, 0], sizes = [1, 8], strides = [1, 1]} : vector<4x8xf32> to vector<1x8xf32>
    %57 = vector.broadcast %55 : f32 to vector<1x8xf32>
    %58 = arith.mulf %57, %56 : vector<1x8xf32>
    %59 = arith.addf %53, %58 : vector<1x8xf32>
    %c2_31 = arith.constant 2 : index
    %c2_32 = arith.constant 2 : index
    %60 = memref.load %arg1[%c2_31, %c2_32] : memref<5x4xf32, #tpu.memory_space<smem>>
    %cst_33 = arith.constant 4.000000e+00 : f32
    %61 = arith.mulf %60, %cst_33 : f32
    %62 = vector.extract_strided_slice %0 {offsets = [2, 0], sizes = [1, 8], strides = [1, 1]} : vector<4x8xf32> to vector<1x8xf32>
    %63 = vector.broadcast %61 : f32 to vector<1x8xf32>
    %64 = arith.mulf %63, %62 : vector<1x8xf32>
    %65 = arith.addf %59, %64 : vector<1x8xf32>
    %c2_34 = arith.constant 2 : index
    %c3_35 = arith.constant 3 : index
    %66 = memref.load %arg1[%c2_34, %c3_35] : memref<5x4xf32, #tpu.memory_space<smem>>
    %cst_36 = arith.constant 4.000000e+00 : f32
    %67 = arith.mulf %66, %cst_36 : f32
    %68 = vector.extract_strided_slice %0 {offsets = [3, 0], sizes = [1, 8], strides = [1, 1]} : vector<4x8xf32> to vector<1x8xf32>
    %69 = vector.broadcast %67 : f32 to vector<1x8xf32>
    %70 = arith.mulf %69, %68 : vector<1x8xf32>
    %71 = arith.addf %65, %70 : vector<1x8xf32>
    %c2_37 = arith.constant 2 : index
    %c0_38 = arith.constant 0 : index
    %72 = vector.load %arg3[%c2_37, %c0_38] : memref<5x8xf32, #tpu.memory_space<vmem>>, vector<1x8xf32>
    tpu.vector_store %arg3[%c2_37, %c0_38], %71 {strides = array<i32>} : memref<5x8xf32, #tpu.memory_space<vmem>>, vector<1x8xf32>,
    %c3_39 = arith.constant 3 : index
    %c0_40 = arith.constant 0 : index
    %73 = memref.load %arg1[%c3_39, %c0_40] : memref<5x4xf32, #tpu.memory_space<smem>>
    %cst_41 = arith.constant 4.000000e+00 : f32
    %74 = arith.mulf %73, %cst_41 : f32
    %75 = vector.extract_strided_slice %0 {offsets = [0, 0], sizes = [1, 8], strides = [1, 1]} : vector<4x8xf32> to vector<1x8xf32>
    %76 = vector.broadcast %74 : f32 to vector<1x8xf32>
    %77 = arith.mulf %76, %75 : vector<1x8xf32>
    %c3_42 = arith.constant 3 : index
    %c1_43 = arith.constant 1 : index
    %78 = memref.load %arg1[%c3_42, %c1_43] : memref<5x4xf32, #tpu.memory_space<smem>>
    %cst_44 = arith.constant 4.000000e+00 : f32
    %79 = arith.mulf %78, %cst_44 : f32
    %80 = vector.extract_strided_slice %0 {offsets = [1, 0], sizes = [1, 8], strides = [1, 1]} : vector<4x8xf32> to vector<1x8xf32>
    %81 = vector.broadcast %79 : f32 to vector<1x8xf32>
    %82 = arith.mulf %81, %80 : vector<1x8xf32>
    %83 = arith.addf %77, %82 : vector<1x8xf32>
    %c3_45 = arith.constant 3 : index
    %c2_46 = arith.constant 2 : index
    %84 = memref.load %arg1[%c3_45, %c2_46] : memref<5x4xf32, #tpu.memory_space<smem>>
    %cst_47 = arith.constant 4.000000e+00 : f32
    %85 = arith.mulf %84, %cst_47 : f32
    %86 = vector.extract_strided_slice %0 {offsets = [2, 0], sizes = [1, 8], strides = [1, 1]} : vector<4x8xf32> to vector<1x8xf32>
    %87 = vector.broadcast %85 : f32 to vector<1x8xf32>
    %88 = arith.mulf %87, %86 : vector<1x8xf32>
    %89 = arith.addf %83, %88 : vector<1x8xf32>
    %c3_48 = arith.constant 3 : index
    %c3_49 = arith.constant 3 : index
    %90 = memref.load %arg1[%c3_48, %c3_49] : memref<5x4xf32, #tpu.memory_space<smem>>
    %cst_50 = arith.constant 4.000000e+00 : f32
    %91 = arith.mulf %90, %cst_50 : f32
    %92 = vector.extract_strided_slice %0 {offsets = [3, 0], sizes = [1, 8], strides = [1, 1]} : vector<4x8xf32> to vector<1x8xf32>
    %93 = vector.broadcast %91 : f32 to vector<1x8xf32>
    %94 = arith.mulf %93, %92 : vector<1x8xf32>
    %95 = arith.addf %89, %94 : vector<1x8xf32>
    %c3_51 = arith.constant 3 : index
    %c0_52 = arith.constant 0 : index
    %96 = vector.load %arg3[%c3_51, %c0_52] : memref<5x8xf32, #tpu.memory_space<vmem>>, vector<1x8xf32>
    tpu.vector_store %arg3[%c3_51, %c0_52], %95 {strides = array<i32>} : memref<5x8xf32, #tpu.memory_space<vmem>>, vector<1x8xf32>,
    %c4 = arith.constant 4 : index
    %c0_53 = arith.constant 0 : index
    %97 = memref.load %arg1[%c4, %c0_53] : memref<5x4xf32, #tpu.memory_space<smem>>
    %cst_54 = arith.constant 4.000000e+00 : f32
    %98 = arith.mulf %97, %cst_54 : f32
    %99 = vector.extract_strided_slice %0 {offsets = [0, 0], sizes = [1, 8], strides = [1, 1]} : vector<4x8xf32> to vector<1x8xf32>
    %100 = vector.broadcast %98 : f32 to vector<1x8xf32>
    %101 = arith.mulf %100, %99 : vector<1x8xf32>
    %c4_55 = arith.constant 4 : index
    %c1_56 = arith.constant 1 : index
    %102 = memref.load %arg1[%c4_55, %c1_56] : memref<5x4xf32, #tpu.memory_space<smem>>
    %cst_57 = arith.constant 4.000000e+00 : f32
    %103 = arith.mulf %102, %cst_57 : f32
    %104 = vector.extract_strided_slice %0 {offsets = [1, 0], sizes = [1, 8], strides = [1, 1]} : vector<4x8xf32> to vector<1x8xf32>
    %105 = vector.broadcast %103 : f32 to vector<1x8xf32>
    %106 = arith.mulf %105, %104 : vector<1x8xf32>
    %107 = arith.addf %101, %106 : vector<1x8xf32>
    %c4_58 = arith.constant 4 : index
    %c2_59 = arith.constant 2 : index
    %108 = memref.load %arg1[%c4_58, %c2_59] : memref<5x4xf32, #tpu.memory_space<smem>>
    %cst_60 = arith.constant 4.000000e+00 : f32
    %109 = arith.mulf %108, %cst_60 : f32
    %110 = vector.extract_strided_slice %0 {offsets = [2, 0], sizes = [1, 8], strides = [1, 1]} : vector<4x8xf32> to vector<1x8xf32>
    %111 = vector.broadcast %109 : f32 to vector<1x8xf32>
    %112 = arith.mulf %111, %110 : vector<1x8xf32>
    %113 = arith.addf %107, %112 : vector<1x8xf32>
    %c4_61 = arith.constant 4 : index
    %c3_62 = arith.constant 3 : index
    %114 = memref.load %arg1[%c4_61, %c3_62] : memref<5x4xf32, #tpu.memory_space<smem>>
    %cst_63 = arith.constant 4.000000e+00 : f32
    %115 = arith.mulf %114, %cst_63 : f32
    %116 = vector.extract_strided_slice %0 {offsets = [3, 0], sizes = [1, 8], strides = [1, 1]} : vector<4x8xf32> to vector<1x8xf32>
    %117 = vector.broadcast %115 : f32 to vector<1x8xf32>
    %118 = arith.mulf %117, %116 : vector<1x8xf32>
    %119 = arith.addf %113, %118 : vector<1x8xf32>
    %c4_64 = arith.constant 4 : index
    %c0_65 = arith.constant 0 : index
    %120 = vector.load %arg3[%c4_64, %c0_65] : memref<5x8xf32, #tpu.memory_space<vmem>>, vector<1x8xf32>
    tpu.vector_store %arg3[%c4_64, %c0_65], %119 {strides = array<i32>} : memref<5x8xf32, #tpu.memory_space<vmem>>, vector<1x8xf32>,
    return
  }
  func.func @transform_0(%arg0: i32) -> (i32, i32) {
    %c0_i32 = arith.constant 0 : i32
    %c0_i32_0 = arith.constant 0 : i32
    %c0_i32_1 = arith.constant 0 : i32
    return %c0_i32, %c0_i32_0 : i32, i32
  }
  func.func @transform_1(%arg0: i32) -> (i32, i32) {
    %c0_i32 = arith.constant 0 : i32
    %c0_i32_0 = arith.constant 0 : i32
    return %c0_i32, %arg0 : i32, i32
  }
  func.func @transform_2(%arg0: i32) -> (i32, i32) {
    %c0_i32 = arith.constant 0 : i32
    %c0_i32_0 = arith.constant 0 : i32
    return %c0_i32, %arg0 : i32, i32
  }
}

</mosaic_0001>

<bundles_post_ra>
// kernel: tpu_custom_call.1
= control target key start
LH: loop header
LB: loop body
LE: loop exit
PB: predicated region body
PF: predicated region fallthrough
CT: control target
= control target key end

     0   :  { %7 = vsyncpa [#allocation4], 0  ;;  %s345_s0 = inlined_call_operand.vmem [shape: f32[5,4], index: 0, kind: input, shape index: {}]   ;;  %s346_s1 = inlined_call_operand.vmem [shape: f32[4,8], index: 1, kind: input, shape index: {}]   ;;  %s347_s2 = inlined_call_operand.hbm [shape: f32[5,8], index: 2, kind: output, shape index: {}]  }
   0x1   :  { %8 = vsyncpa [#allocation3], 0  ;;  %s14_s11 = sshll.u32 %s345_s0, 4  ;;  %s250_s12 = smov [#allocation2]   ;;  %s15_s11 = int_to_ptr.vmem [resolvable:$true] %s14_s11 }
   0x2   :  { %17 = dma.vmem_to_smem %s15_s11, 128, %s250_s12, [#allocation4]  }
   0x3   :  { %246 = dma.done.wait [#allocation4], 128  }
   0x4   :  { %247 = vsyncadd [#allocation4], 4294967168 }
   0x5   :  { %24 = sfence }
   0x6   :  { %s26_s13 = sld [smem:[#allocation2]]  ;;  %v275_v0 = vld [vmem:[%s346_s1] sm:$0xf]  ;;  %vm54_vm0 = vcmask 57344  }
   0x7   :  { %s189_s14 = sld [smem:[#allocation2 + $0x1]] }
   0x8   :  { %s190_s15 = sld [smem:[#allocation2 + $0x2]] }
   0x9   :  { %s191_s16 = sld [smem:[#allocation2 + $0x3]] }
   0xa   :  { %s192_s17 = sld [smem:[#allocation2 + $0x80]] }
   0xb   :  { %s193_s18 = sld [smem:[#allocation2 + $0x81]] }
   0xc   :  { %s27_s19 = smul.f32 4.0, %s26_s13  ;;  %s270_s20 = sld [smem:[#allocation2 + $0x82]] }
   0xd   :  { %s31_s0 = smul.f32 4.0, %s189_s14  ;;  %s277_s23 = sld [smem:[#allocation2 + $0x83]] }
   0xe   :  { %v28_v1 = vstv %s27_s19  ;;  %s39_s24 = smul.f32 4.0, %s190_s15  ;;  %s279_s25 = sld [smem:[#allocation2 + $0x100]] }
   0xf   :  { %v32_v2 = vstv %s31_s0  ;;  %s47_s26 = smul.f32 4.0, %s191_s16  ;;  %s281_s27 = sld [smem:[#allocation2 + $0x101]]  ;;  %v29_v3 = vmul.f32 %v28_v1, %v275_v0 }
  0x10   :  { %v33_v4 = vmul.f32 %v32_v2, %v275_v0  ;;  %v40_v5 = vstv %s39_s24  ;;  %s57_s1 = smul.f32 4.0, %s192_s17  ;;  %s285_s28 = sld [smem:[#allocation2 + $0x102]] }
  0x11   :  { %v41_v6 = vmul.f32 %v40_v5, %v275_v0  ;;  %v48_v7 = vstv %s47_s26  ;;  %s61_s29 = smul.f32 4.0, %s193_s18  ;;  %s288_s30 = sld [smem:[#allocation2 + $0x103]] }
  0x12   :  { %v35_v8 = vrot.slane %v33_v4, 1  ;;  %v49_v9 = vmul.f32 %v48_v7, %v275_v0  ;;  %v58_v10 = vstv %s57_s1  ;;  %s69_s3 = smul.f32 4.0, %s270_s20  ;;  %s292_s4 = sld [smem:[#allocation2 + $0x180]] }
  0x13   :  { %v43_v11 = vrot.slane %v41_v6, 2  ;;  %v59_v12 = vmul.f32 %v58_v10, %v275_v0  ;;  %v62_v13 = vstv %s61_s29  ;;  %s77_s5 = smul.f32 4.0, %s277_s23  ;;  %s296_s6 = sld [smem:[#allocation2 + $0x181]] }
  0x14   :  { %v37_v14 = vadd.f32 %v35_v8, %v29_v3  ;;  %v51_v15 = vrot.slane %v49_v9, 3  ;;  %v63_v16 = vmul.f32 %v62_v13, %v275_v0  ;;  %v70_v17 = vstv %s69_s3  ;;  %s86_s7 = smul.f32 4.0, %s279_s25  ;;  %s300_s8 = sld [smem:[#allocation2 + $0x182]] }
  0x15   :  { %v71_v18 = vmul.f32 %v70_v17, %v275_v0  ;;  %v78_v19 = vstv %s77_s5  ;;  %s90_s9 = smul.f32 4.0, %s281_s27  ;;  %s304_s10 = sld [smem:[#allocation2 + $0x183]] }
  0x16   :  { %v45_v20 = vadd.f32 %v43_v11, %v37_v14  ;;  %v65_v21 = vrot.slane %v63_v16, 1  ;;  %v79_v22 = vmul.f32 %v78_v19, %v275_v0  ;;  %v87_v23 = vstv %s86_s7  ;;  %s98_s11 = smul.f32 4.0, %s285_s28  ;;  %s308_s12 = sld [smem:[#allocation2 + $0x200]] }
  0x17   :  { %v73_v24 = vrot.slane %v71_v18, 2  ;;  %v88_v25 = vmul.f32 %v87_v23, %v275_v0  ;;  %v91_v26 = vstv %s90_s9  ;;  %s106_s13 = smul.f32 4.0, %s288_s30  ;;  %s312_s14 = sld [smem:[#allocation2 + $0x201]] }
  0x18   :  { %v53_v27 = vadd.f32 %v51_v15, %v45_v20  ;;  %v67_v28 = vadd.f32 %v65_v21, %v59_v12  ;;  %v81_v29 = vrot.slane %v79_v22, 3  ;;  %v92_v30 = vmul.f32 %v91_v26, %v275_v0  ;;  %s115_s15 = smul.f32 4.0, %s292_s4  ;;  %s316_s16 = sld [smem:[#allocation2 + $0x202]] }
  0x19   :  { %v99_v31 = vstv %s98_s11  ;;  %v107_v32 = vstv %s106_s13  ;;  %s119_s17 = smul.f32 4.0, %s296_s6  ;;  %s319_s18 = sld [smem:[#allocation2 + $0x203]] }
  0x1a   :  { %55 = vst.msk [vmem:[#allocation5] sm:$0x1] %vm54_vm0, %v53_v27  ;;  %v75_v33 = vadd.f32 %v73_v24, %v67_v28  ;;  %v94_v34 = vrot.slane %v92_v30, 1  ;;  %v100_v35 = vmul.f32 %v99_v31, %v275_v0  ;;  %v108_v36 = vmul.f32 %v107_v32, %v275_v0  ;;  %s127_s19 = smul.f32 4.0, %s300_s8  ;;  %s251_s24 = smov [#allocation5]  }
  0x1b   :  { %v116_v37 = vstv %s115_s15  ;;  %v120_v38 = vstv %s119_s17  ;;  %s135_s20 = smul.f32 4.0, %s304_s10  ;;  %s177_s25 = sshll.u32 %s251_s24, 4  ;;  %s178_s25 = int_to_ptr.vmem [resolvable:$true] %s177_s25 }
  0x1c   :  { %v83_v39 = vadd.f32 %v81_v29, %v75_v33  ;;  %v96_v40 = vadd.f32 %v94_v34, %v88_v25  ;;  %v102_v41 = vrot.slane %v100_v35, 2  ;;  %v110_v42 = vrot.slane %v108_v36, 3  ;;  %s144_s21 = smul.f32 4.0, %s308_s12  ;;  %s179_s1 = sshll.u32 %s347_s2, 4  ;;  %s180_s1 = int_to_ptr.hbm [resolvable:$true] %s179_s1 }
  0x1d   :  { %v117_v43 = vmul.f32 %v116_v37, %v275_v0  ;;  %v121_v44 = vmul.f32 %v120_v38, %v275_v0  ;;  %v128_v45 = vstv %s127_s19  ;;  %v136_v46 = vstv %s135_s20  ;;  %s148_s22 = smul.f32 4.0, %s312_s14 }
  0x1e   :  { %84 = vst.msk [vmem:[#allocation5 + $0x1] sm:$0x1] %vm54_vm0, %v83_v39  ;;  %v104_v47 = vadd.f32 %v102_v41, %v96_v40  ;;  %v129_v48 = vmul.f32 %v128_v45, %v275_v0  ;;  %v137_v49 = vmul.f32 %v136_v46, %v275_v0  ;;  %v145_v50 = vstv %s144_s21  ;;  %s156_s0 = smul.f32 4.0, %s316_s16 }
  0x1f   :  { %v123_v51 = vrot.slane %v121_v44, 1  ;;  %v149_v52 = vstv %s148_s22  ;;  %s164_s23 = smul.f32 4.0, %s319_s18  ;;  %v146_v55 = vmul.f32 %v145_v50, %v275_v0 }
  0x20   :  { %v112_v53 = vadd.f32 %v110_v42, %v104_v47  ;;  %v131_v54 = vrot.slane %v129_v48, 2  ;;  %v150_v56 = vmul.f32 %v149_v52, %v275_v0  ;;  %v139_v58 = vrot.slane %v137_v49, 3 }
  0x21   :  { %v125_v57 = vadd.f32 %v123_v51, %v117_v43  ;;  %v157_v59 = vstv %s156_s0  ;;  %v165_v60 = vstv %s164_s23 }
  0x22   :  { %113 = vst.msk [vmem:[#allocation5 + $0x2] sm:$0x1] %vm54_vm0, %v112_v53  ;;  %v152_v61 = vrot.slane %v150_v56, 1  ;;  %v158_v62 = vmul.f32 %v157_v59, %v275_v0  ;;  %v166_v63 = vmul.f32 %v165_v60, %v275_v0 }
  0x23   :  { %v133_v1 = vadd.f32 %v131_v54, %v125_v57 }
  0x24   :  { %v154_v2 = vadd.f32 %v152_v61, %v146_v55  ;;  %v160_v3 = vrot.slane %v158_v62, 2  ;;  %v168_v4 = vrot.slane %v166_v63, 3 }
  0x25   :  { %v141_v5 = vadd.f32 %v139_v58, %v133_v1 }
  0x26   :  { %v162_v6 = vadd.f32 %v160_v3, %v154_v2 }
  0x27   :  { %142 = vst.msk [vmem:[#allocation5 + $0x3] sm:$0x1] %vm54_vm0, %v141_v5 }
  0x28   :  { %v170_v7 = vadd.f32 %v168_v4, %v162_v6 }
  0x2a   :  { %171 = vst.msk [vmem:[#allocation5 + $0x4] sm:$0x1] %vm54_vm0, %v170_v7 }
  0x2b   :  { %182 = dma.vmem_to_hbm [thread:$0]  %s178_s25, 128, %s180_s1, [#allocation3]  }
  0x2c   :  { %248 = dma.done.wait [#allocation3], 128  }
  0x2d   :  { %249 = vsyncadd [#allocation3], 4294967168 }
  0x2e   :  { %187 = vsyncpa [#allocation3], 1 }
  0x2f   :  { %188 = vsyncpa [#allocation4], 1 }

</bundles_post_ra>
